<compile_context>
chip_gen: v6e
topology: v6e:2x2x1
jax: 0.10.0
libtpu: 0.0.40
codegen_flags: <defaults>
</compile_context>

<pallas_src>
import functools

import jax
import jax.numpy as jnp
from jax import lax
from jax.experimental import pallas as pl
from jax.experimental.pallas import tpu as pltpu

BN_EPS = 1e-5
BACKBONE_IMG_FEAT_DIM = 512                 # cfg.backbone_img_feat_dim (synthetic)
RESNET50_LAYERS = [(64, 3, 1), (128, 4, 2), (256, 6, 2), (512, 3, 2)]

ACT_DTYPE = jnp.bfloat16                    # activation / matmul-input dtype
MAX_TILE_M = 512                            # row tile for the 1x1-conv matmuls
TILE_K = 1024                               # K tile for the large-K layers
SUBLANE_ALIGN = 16                          # bf16 sublane packing
HEAD_TILE_N = 8
VMEM_LIMIT = 32 * 1024 * 1024               # fits v5e scoped & v7x physical VMEM


def _round_up(x, m):
    return (x + m - 1) // m * m


# --------------------------- Pallas kernels ---------------------------------

def _mm_bn_kernel(x_ref, w_ref, scale_ref, shift_ref, o_ref, acc_ref, *, relu):
    # acc += x @ w (f32);  at last K step: y = acc*scale + shift (+relu)
    k = pl.program_id(1)

    @pl.when(k == 0)
    def _():
        acc_ref[...] = jnp.zeros_like(acc_ref)

    acc_ref[...] += jnp.dot(x_ref[...], w_ref[...],
                            preferred_element_type=jnp.float32)

    @pl.when(k == pl.num_programs(1) - 1)
    def _():
        y = acc_ref[...] * scale_ref[...] + shift_ref[...]
        if relu:
            y = jnp.maximum(y, 0.0)
        o_ref[...] = y.astype(o_ref.dtype)


def _mm_bn_res_kernel(x_ref, w_ref, scale_ref, shift_ref, res_ref, o_ref, acc_ref):
    # acc += x @ w;  at last K step: y = relu(acc*scale + shift + residual)
    k = pl.program_id(1)

    @pl.when(k == 0)
    def _():
        acc_ref[...] = jnp.zeros_like(acc_ref)

    acc_ref[...] += jnp.dot(x_ref[...], w_ref[...],
                            preferred_element_type=jnp.float32)

    @pl.when(k == pl.num_programs(1) - 1)
    def _():
        y = (acc_ref[...] * scale_ref[...] + shift_ref[...]
             + res_ref[...].astype(jnp.float32))
        o_ref[...] = jnp.maximum(y, 0.0).astype(o_ref.dtype)


def _pool_fc_kernel(feat_ref, w_ref, b_ref, o_ref, *, inv_hw):
    # feat: (TILE_N, H*W, 2048) channels-last -> sublane-axis mean -> fc -> relu
    pooled = jnp.sum(feat_ref[...].astype(jnp.float32), axis=1) * inv_hw
    y = jnp.dot(pooled.astype(w_ref.dtype), w_ref[...],
                preferred_element_type=jnp.float32)
    o_ref[...] = jnp.maximum(y + b_ref[...], 0.0)      # relu_final=True


# --------------------------- Pallas wrappers ---------------------------------

def fused_matmul_bn(x, w, scale, shift, *, relu, residual=None,
                    out_dtype=ACT_DTYPE):
    """y = [relu]((x @ w) * scale + shift [+ residual]) tiled over M (and K)."""
    m, k_dim = x.shape
    cout = w.shape[1]

    tile_m = MAX_TILE_M if m >= MAX_TILE_M else _round_up(m, SUBLANE_ALIGN)
    m_pad = _round_up(m, tile_m)
    if m_pad != m:
        x = jnp.pad(x, ((0, m_pad - m), (0, 0)))
        if residual is not None:
            residual = jnp.pad(residual, ((0, m_pad - m), (0, 0)))

    tile_k = TILE_K if (k_dim > TILE_K and k_dim % TILE_K == 0) else k_dim
    num_m = m_pad // tile_m
    num_k = k_dim // tile_k

    x_spec = pl.BlockSpec((tile_m, tile_k), lambda i, kk: (i, kk))
    w_spec = pl.BlockSpec((tile_k, cout), lambda i, kk: (kk, 0))     # VMEM-resident
    s_spec = pl.BlockSpec((1, cout), lambda i, kk: (0, 0))
    o_spec = pl.BlockSpec((tile_m, cout), lambda i, kk: (i, 0))

    bytes_acc = (x.size * 2 + w.size * 2 + 2 * cout * 4
                 + m_pad * cout * jnp.dtype(out_dtype).itemsize)
    if residual is None:
        kernel = functools.partial(_mm_bn_kernel, relu=relu)
        in_specs = [x_spec, w_spec, s_spec, s_spec]
        args = (x, w, scale, shift)
    else:
        kernel = _mm_bn_res_kernel
        in_specs = [x_spec, w_spec, s_spec, s_spec,
                    pl.BlockSpec((tile_m, cout), lambda i, kk: (i, 0))]
        args = (x, w, scale, shift, residual)
        bytes_acc += residual.size * 2

    ym = pl.pallas_call(
        kernel,
        grid=(num_m, num_k),
        in_specs=in_specs,
        out_specs=o_spec,
        out_shape=jax.ShapeDtypeStruct((m_pad, cout), out_dtype),
        scratch_shapes=[pltpu.VMEM((tile_m, cout), jnp.float32)],
        compiler_params=pltpu.CompilerParams(
            dimension_semantics=("parallel", "arbitrary"),
            vmem_limit_bytes=VMEM_LIMIT),
        cost_estimate=pl.CostEstimate(
            flops=2 * m_pad * k_dim * cout, transcendentals=0,
            bytes_accessed=int(bytes_acc)),
    )(*args)
    return ym[:m] if m_pad != m else ym


def pool_fc_relu(feat, w, b):
    """Fused global average pool (over H*W) + Linear(2048, D) + ReLU."""
    n, hw, c = feat.shape
    d = w.shape[1]
    n_pad = _round_up(n, HEAD_TILE_N)
    if n_pad != n:
        feat = jnp.pad(feat, ((0, n_pad - n), (0, 0), (0, 0)))

    kernel = functools.partial(_pool_fc_kernel, inv_hw=1.0 / hw)
    out = pl.pallas_call(
        kernel,
        grid=(n_pad // HEAD_TILE_N,),
        in_specs=[pl.BlockSpec((HEAD_TILE_N, hw, c), lambda i: (i, 0, 0)),
                  pl.BlockSpec((c, d), lambda i: (0, 0)),
                  pl.BlockSpec((1, d), lambda i: (0, 0))],
        out_specs=pl.BlockSpec((HEAD_TILE_N, d), lambda i: (i, 0)),
        out_shape=jax.ShapeDtypeStruct((n_pad, d), jnp.float32),
        compiler_params=pltpu.CompilerParams(
            dimension_semantics=("parallel",), vmem_limit_bytes=VMEM_LIMIT),
        cost_estimate=pl.CostEstimate(
            flops=2 * n_pad * c * d + n_pad * hw * c, transcendentals=0,
            bytes_accessed=int(feat.size * 2 + c * d * 2 + d * 4 + n_pad * d * 4)),
    )(feat, w, b)
    return out[:n]


# --------------------------- parameter init ---------------------------------

def _conv_w(key, cout, cin, k):
    fan_in = cin * k * k
    return jax.random.normal(key, (cout, cin, k, k), jnp.float32) * (2.0 / fan_in) ** 0.5


def _bn(key, c):
    k1, k2, k3, k4 = jax.random.split(key, 4)
    return dict(
        gamma=1.0 + 0.1 * jax.random.normal(k1, (c,), jnp.float32),
        beta=0.1 * jax.random.normal(k2, (c,), jnp.float32),
        mean=0.1 * jax.random.normal(k3, (c,), jnp.float32),
        var=jax.random.uniform(k4, (c,), jnp.float32, minval=0.5, maxval=1.5),
    )


def _fold_bn(bn):
    scale = bn['gamma'] / jnp.sqrt(bn['var'] + BN_EPS)
    shift = bn['beta'] - bn['mean'] * scale
    return scale, shift


def init_params(key):
    """Raw ResNet-50-style parameters (PyTorch-like OIHW + BN dicts, f32)."""
    keys = iter(jax.random.split(key, 512))
    p = {'conv1_w': _conv_w(next(keys), 64, 3, 7), 'bn1': _bn(next(keys), 64)}
    inplanes = 64
    blocks = []
    for planes, nblocks, stride in RESNET50_LAYERS:
        for bi in range(nblocks):
            s = stride if bi == 0 else 1
            blk = {
                'conv1_w': _conv_w(next(keys), planes, inplanes, 1),
                'bn1': _bn(next(keys), planes),
                'conv2_w': _conv_w(next(keys), planes, planes, 3),
                'bn2': _bn(next(keys), planes),
                'conv3_w': _conv_w(next(keys), planes * 4, planes, 1),
                'bn3': _bn(next(keys), planes * 4),
                'stride': s,
            }
            if s != 1 or inplanes != planes * 4:
                blk['down_w'] = _conv_w(next(keys), planes * 4, inplanes, 1)
                blk['down_bn'] = _bn(next(keys), planes * 4)
            blocks.append(blk)
            inplanes = planes * 4
    p['blocks'] = blocks
    kw, kb = jax.random.split(next(keys))
    bound = 1.0 / (2048 ** 0.5)
    p['fc_w'] = jax.random.uniform(kw, (2048, BACKBONE_IMG_FEAT_DIM), jnp.float32,
                                   minval=-bound, maxval=bound)
    p['fc_b'] = jax.random.uniform(kb, (BACKBONE_IMG_FEAT_DIM,), jnp.float32,
                                   minval=-bound, maxval=bound)
    return p


def prepare_params(raw):
    """Fold BN (eval mode), convert to channels-last layouts and bf16 weights."""
    def bn2d(bn):
        s, b = _fold_bn(bn)
        return s.reshape(1, 1, 1, -1), b.reshape(1, 1, 1, -1)

    def bn1d(bn):
        s, b = _fold_bn(bn)
        return s.reshape(1, -1), b.reshape(1, -1)

    def w_1x1(w):                         # OIHW (O,I,1,1) -> (I, O) bf16
        o, i = w.shape[:2]
        return jnp.transpose(w.reshape(o, i)).astype(ACT_DTYPE)

    def w_spatial(w):                     # OIHW -> HWIO bf16
        return jnp.transpose(w, (2, 3, 1, 0)).astype(ACT_DTYPE)

    p = {'conv1_w': w_spatial(raw['conv1_w'])}
    p['conv1_scale'], p['conv1_shift'] = bn2d(raw['bn1'])
    blocks = []
    for blk in raw['blocks']:
        nb = {'stride': blk['stride']}
        nb['w1'] = w_1x1(blk['conv1_w']); nb['s1'], nb['b1'] = bn1d(blk['bn1'])
        nb['w2'] = w_spatial(blk['conv2_w']); nb['s2'], nb['b2'] = bn2d(blk['bn2'])
        nb['w3'] = w_1x1(blk['conv3_w']); nb['s3'], nb['b3'] = bn1d(blk['bn3'])
        if 'down_w' in blk:
            nb['down_w'] = w_1x1(blk['down_w'])
            nb['down_scale'], nb['down_shift'] = bn1d(blk['down_bn'])
        blocks.append(nb)
    p['blocks'] = blocks
    p['fc_w'] = raw['fc_w'].astype(ACT_DTYPE)
    p['fc_b'] = raw['fc_b'].reshape(1, -1).astype(jnp.float32)
    return p


# --------------------------- forward pass -----------------------------------

def conv1x1_bn(x, w_kc, scale, shift, *, stride=1, relu=True, residual=None):
    """1x1 conv (NHWC) + folded BN (+ residual + relu) as a tiled Pallas matmul."""
    if stride > 1:
        x = x[:, ::stride, ::stride, :]          # exact for 1x1 kernels
    n, h, ww, c = x.shape
    cout = w_kc.shape[1]
    xm = x.reshape(n * h * ww, c)                # channels-last: no transpose
    rm = residual.reshape(n * h * ww, cout) if residual is not None else None
    ym = fused_matmul_bn(xm, w_kc, scale, shift, relu=relu, residual=rm)
    return ym.reshape(n, h, ww, cout)


def conv_bn_lax(x, w_hwio, scale, shift, stride, pad, relu=True):
    # TODO(synk): spatial (7x7 stem / 3x3 bottleneck) convolutions stay on
    # lax.conv_general_dilated; only 1x1 convs and the head run in Pallas.
    y = lax.conv_general_dilated(
        x, w_hwio, (stride, stride), [(pad, pad), (pad, pad)],
        dimension_numbers=('NHWC', 'HWIO', 'NHWC'),
        preferred_element_type=jnp.float32)
    y = y * scale + shift
    if relu:
        y = jnp.maximum(y, 0.0)
    return y.astype(ACT_DTYPE)


def max_pool_3x3_s2(x):
    neg_inf = jnp.array(-jnp.inf, dtype=x.dtype)
    return lax.reduce_window(x, neg_inf, lax.max,
                             (1, 3, 3, 1), (1, 2, 2, 1),
                             [(0, 0), (1, 1), (1, 1), (0, 0)])


def bottleneck(x, blk):
    stride = blk['stride']
    if 'down_w' in blk:
        # TODO(synk): for stride-1 downsample blocks the downsample and conv1
        # matmuls could share one read of x by concatenating weights along Cout.
        identity = conv1x1_bn(x, blk['down_w'], blk['down_scale'], blk['down_shift'],
                              stride=stride, relu=False)
    else:
        identity = x
    y = conv1x1_bn(x, blk['w1'], blk['s1'], blk['b1'], stride=1, relu=True)
    y = conv_bn_lax(y, blk['w2'], blk['s2'], blk['b2'], stride=stride, pad=1,
                    relu=True)
    # conv3 + bn3 + residual add + relu fused in one Pallas kernel
    y = conv1x1_bn(y, blk['w3'], blk['s3'], blk['b3'], stride=1, relu=False,
                   residual=identity)
    return y


def backbone_net_forward(params, img):
    # external interface is NCHW like PyTorch; single transpose to NHWC here
    x = jnp.transpose(img, (0, 2, 3, 1)).astype(ACT_DTYPE)
    x = conv_bn_lax(x, params['conv1_w'], params['conv1_scale'],
                    params['conv1_shift'], stride=2, pad=3, relu=True)
    x = max_pool_3x3_s2(x)
    for blk in params['blocks']:
        x = bottleneck(x, blk)
    n, h, w, c = x.shape
    assert c == 2048
    # F.avg_pool2d(feat, (H, W)).view(-1, 2048) ; fc ; ReLU -> fused Pallas kernel
    feat = x.reshape(n, h * w, c)                # channels on the 128-lane axis
    return pool_fc_relu(feat, params['fc_w'], params['fc_b'])


# --------------------------- driver ------------------------------------------

if __name__ == "__main__":
    key = jax.random.PRNGKey(0)
    kp, kx = jax.random.split(key)
    raw_params = init_params(kp)
    params = prepare_params(raw_params)
    img = jax.random.normal(kx, (2, 3, 64, 64), jnp.float32)   # NCHW, like PyTorch
    out = backbone_net_forward(params, img)
    out = jax.block_until_ready(out)
    assert out.shape == (2, BACKBONE_IMG_FEAT_DIM), out.shape
    assert bool(jnp.all(jnp.isfinite(out)))
    assert bool(jnp.all(out >= 0.0))   # final ReLU
    print("KERNEL_OK")
</pallas_src>

<mosaic_0001>
module attributes {stable_mosaic.version = 11 : i64} {
  func.func @_mm_bn_kernel(%arg0: i32, %arg1: i32, %arg2: memref<512x64xbf16, #tpu.memory_space<vmem>>, %arg3: memref<64x256xbf16, #tpu.memory_space<vmem>>, %arg4: memref<1x256xf32, #tpu.memory_space<vmem>>, %arg5: memref<1x256xf32, #tpu.memory_space<vmem>>, %arg6: memref<512x256xbf16, #tpu.memory_space<vmem>>, %arg7: memref<512x256xf32, #tpu.memory_space<vmem>>) attributes {dimension_semantics = [#tpu.dimension_semantics<parallel>, #tpu.dimension_semantics<arbitrary>], iteration_bounds = array<i64: 1, 1>, scalar_prefetch = 0 : i64, scratch_operands = 1 : i64, tpu.core_type = #tpu.core_type<tc>, window_params = [{transform_indices = @transform_0, window_bounds = array<i64: 512, 64>}, {transform_indices = @transform_1, window_bounds = array<i64: 64, 256>}, {pipeline_mode = #tpu.pipeline_mode<synchronous>, transform_indices = @transform_2, window_bounds = array<i64: 1, 256>}, {pipeline_mode = #tpu.pipeline_mode<synchronous>, transform_indices = @transform_3, window_bounds = array<i64: 1, 256>}, {transform_indices = @transform_4, window_bounds = array<i64: 512, 256>}]} {
    %c0_i32 = arith.constant 0 : i32
    %0 = arith.cmpi eq, %arg1, %c0_i32 : i32
    %1 = arith.extui %0 : i1 to i32
    %c0_i32_0 = arith.constant 0 : i32
    %2 = arith.cmpi ne, %1, %c0_i32_0 : i32
    scf.if %2 {
      %cst_10 = arith.constant 0.000000e+00 : f32
      %12 = vector.broadcast %cst_10 : f32 to vector<512x256xf32>
      %c0_11 = arith.constant 0 : index
      %c0_12 = arith.constant 0 : index
      %13 = vector.load %arg7[%c0_11, %c0_12] : memref<512x256xf32, #tpu.memory_space<vmem>>, vector<512x256xf32>
      tpu.vector_store %arg7[%c0_11, %c0_12], %12 {strides = array<i32>} : memref<512x256xf32, #tpu.memory_space<vmem>>, vector<512x256xf32>,
    } else {
    }
    %c0 = arith.constant 0 : index
    %c0_1 = arith.constant 0 : index
    %3 = vector.load %arg7[%c0, %c0_1] : memref<512x256xf32, #tpu.memory_space<vmem>>, vector<512x256xf32>
    %c0_2 = arith.constant 0 : index
    %c0_3 = arith.constant 0 : index
    %4 = vector.load %arg2[%c0_2, %c0_3] : memref<512x64xbf16, #tpu.memory_space<vmem>>, vector<512x64xbf16>
    %c0_4 = arith.constant 0 : index
    %c0_5 = arith.constant 0 : index
    %5 = vector.load %arg3[%c0_4, %c0_5] : memref<64x256xbf16, #tpu.memory_space<vmem>>, vector<64x256xbf16>
    %cst = arith.constant dense<0.000000e+00> : vector<512x256xf32>
    %6 = tpu.matmul %4, %5, %cst {dimension_numbers = #tpu.dot_dimension_numbers<[1], [0], [0], [1], [0, 0, 1, 1], [], []>} : vector<512x64xbf16>, vector<64x256xbf16>, vector<512x256xf32> -> vector<512x256xf32>
    %7 = arith.addf %3, %6 : vector<512x256xf32>
    %c0_6 = arith.constant 0 : index
    %c0_7 = arith.constant 0 : index
    %8 = vector.load %arg7[%c0_6, %c0_7] : memref<512x256xf32, #tpu.memory_space<vmem>>, vector<512x256xf32>
    tpu.vector_store %arg7[%c0_6, %c0_7], %7 {strides = array<i32>} : memref<512x256xf32, #tpu.memory_space<vmem>>, vector<512x256xf32>,
    %c0_i32_8 = arith.constant 0 : i32
    %9 = arith.cmpi eq, %arg1, %c0_i32_8 : i32
    %10 = arith.extui %9 : i1 to i32
    %c0_i32_9 = arith.constant 0 : i32
    %11 = arith.cmpi ne, %10, %c0_i32_9 : i32
    scf.if %11 {
      %c0_10 = arith.constant 0 : index
      %c0_11 = arith.constant 0 : index
      %12 = vector.load %arg7[%c0_10, %c0_11] : memref<512x256xf32, #tpu.memory_space<vmem>>, vector<512x256xf32>
      %c0_12 = arith.constant 0 : index
      %c0_13 = arith.constant 0 : index
      %13 = vector.load %arg4[%c0_12, %c0_13] : memref<1x256xf32, #tpu.memory_space<vmem>>, vector<1x256xf32>
      %14 = vector.broadcast %13 : vector<1x256xf32> to vector<512x256xf32>
      %15 = arith.mulf %12, %14 : vector<512x256xf32>
      %c0_14 = arith.constant 0 : index
      %c0_15 = arith.constant 0 : index
      %16 = vector.load %arg5[%c0_14, %c0_15] : memref<1x256xf32, #tpu.memory_space<vmem>>, vector<1x256xf32>
      %17 = vector.broadcast %16 : vector<1x256xf32> to vector<512x256xf32>
      %18 = arith.addf %15, %17 : vector<512x256xf32>
      %19 = arith.truncf %18 : vector<512x256xf32> to vector<512x256xbf16>
      %c0_16 = arith.constant 0 : index
      %c0_17 = arith.constant 0 : index
      %20 = vector.load %arg6[%c0_16, %c0_17] : memref<512x256xbf16, #tpu.memory_space<vmem>>, vector<512x256xbf16>
      tpu.vector_store %arg6[%c0_16, %c0_17], %19 {strides = array<i32>} : memref<512x256xbf16, #tpu.memory_space<vmem>>, vector<512x256xbf16>,
    } else {
    }
    return
  }
  func.func @transform_0(%arg0: i32, %arg1: i32) -> (i32, i32) {
    %c0_i32 = arith.constant 0 : i32
    return %arg0, %arg1 : i32, i32
  }
  func.func @transform_1(%arg0: i32, %arg1: i32) -> (i32, i32) {
    %c0_i32 = arith.constant 0 : i32
    %c0_i32_0 = arith.constant 0 : i32
    return %arg1, %c0_i32 : i32, i32
  }
  func.func @transform_2(%arg0: i32, %arg1: i32) -> (i32, i32) {
    %c0_i32 = arith.constant 0 : i32
    %c0_i32_0 = arith.constant 0 : i32
    %c0_i32_1 = arith.constant 0 : i32
    return %c0_i32, %c0_i32_0 : i32, i32
  }
  func.func @transform_3(%arg0: i32, %arg1: i32) -> (i32, i32) {
    %c0_i32 = arith.constant 0 : i32
    %c0_i32_0 = arith.constant 0 : i32
    %c0_i32_1 = arith.constant 0 : i32
    return %c0_i32, %c0_i32_0 : i32, i32
  }
  func.func @transform_4(%arg0: i32, %arg1: i32) -> (i32, i32) {
    %c0_i32 = arith.constant 0 : i32
    %c0_i32_0 = arith.constant 0 : i32
    return %arg0, %c0_i32 : i32, i32
  }
}

</mosaic_0001>

<bundles_post_ra>
// kernel: tpu_custom_call.1
= control target key start
LH: loop header
LB: loop body
LE: loop exit
PB: predicated region body
PF: predicated region fallthrough
CT: control target
= control target key end

     0   :  { %v2410_v2 = vmov 0   ;;  %vm551_vm0 = vcmask 523264   ;;  %s2896_s0 = inlined_call_operand.vmem [shape: bf16[512,64], index: 0, kind: input, shape index: {}]   ;;  %s2897_s1 = inlined_call_operand.vmem [shape: bf16[64,256], index: 1, kind: input, shape index: {}]   ;;  %s2898_s2 = inlined_call_operand.vmem [shape: f32[1,256], index: 2, kind: input, shape index: {}]   ;;  %s2899_s3 = inlined_call_operand.vmem [shape: f32[1,256], index: 3, kind: input, shape index: {}]   ;;  %s2900_s4 = inlined_call_operand.hbm [shape: bf16[512,256], index: 4, kind: output, shape index: {}]  }
   0x1   :  { %v2344_v0 = vld [vmem:[%s2897_s1 + $0x34] ss:$8 sps:$4 sm:$0xff]   ;;  %v2346_v1 = vld [vmem:[%s2897_s1 + $0x30] ss:$8 sps:$4 sm:$0xff]   ;;  %680 = vmatprep.mubr.bf16.mxu0 %v2410_v2  ;;  %840 = vmatprep.mubr.bf16.mxu1 %v2410_v2  ;;  %v2347_v3 = vld [vmem:[%s2897_s1 + $0x24] ss:$8 sps:$4 sm:$0xff]  }
   0x2   :  { %656 = vmatprep.subr.bf16.mxu0 %v2344_v0  ;;  %2332 = vmatprep.subr.bf16.mxu1 %v2344_v0  ;;  %v2349_v4 = vld [vmem:[%s2897_s1 + $0x20] ss:$8 sps:$4 sm:$0xff]   ;;  %v2350_v5 = vld [vmem:[%s2897_s1 + $0x14] ss:$8 sps:$4 sm:$0xff]   ;;  %v2352_v6 = vld [vmem:[%s2897_s1 + $0x10] ss:$8 sps:$4 sm:$0xff]  }
   0x3   :  { %657 = vmatpush1.bf16.msra.mxu0 %v2346_v1  ;;  %2336 = vmatpush1.bf16.msra.mxu1 %v2346_v1  ;;  %v2353_v7 = vld [vmem:[%s2897_s1 + $0x4] ss:$8 sps:$4 sm:$0xff]   ;;  %v2355_v8 = vld [vmem:[%s2897_s1] ss:$8 sps:$4 sm:$0xff]   ;;  %v2360_v13 = vld [vmem:[%s2896_s0 + $0x10] sm:$0xff]  }
   0x4   :  { %658 = vmatprep.subr.bf16.mxu0 %v2347_v3  ;;  %2333 = vmatprep.subr.bf16.mxu1 %v2347_v3  ;;  %v2356_v9 = vld [vmem:[%s2896_s0] sm:$0xff]   ;;  %v2358_v11 = vld [vmem:[%s2896_s0 + $0x8] sm:$0xff]   ;;  %v2361_v14 = vld [vmem:[%s2896_s0 + $0x90] sm:$0xff]  }
   0x5   :  { %v2357_v10 = vld [vmem:[%s2896_s0 + $0x80] sm:$0xff]   ;;  %v2359_v12 = vld [vmem:[%s2896_s0 + $0x88] sm:$0xff]  }
   0x7   :  { %659 = vmatpush1.bf16.msra.mxu0 %v2349_v4  ;;  %2337 = vmatpush1.bf16.msra.mxu1 %v2349_v4 }
   0x8   :  { %660 = vmatprep.subr.bf16.mxu0 %v2350_v5  ;;  %2334 = vmatprep.subr.bf16.mxu1 %v2350_v5 }
   0xb   :  { %661 = vmatpush1.bf16.msra.mxu0 %v2352_v6  ;;  %2338 = vmatpush1.bf16.msra.mxu1 %v2352_v6 }
   0xc   :  { %662 = vmatprep.subr.bf16.mxu0 %v2353_v7  ;;  %2335 = vmatprep.subr.bf16.mxu1 %v2353_v7 }
   0xf   :  { %663 = vmatpush1.bf16.msra.mxu0 %v2355_v8  ;;  %2339 = vmatpush1.bf16.msra.mxu1 %v2355_v8 }
  0x12   :  { %2172 = vmatmul.mubr.msk.bf16.vlgmr.msra.gmra.mxu0 %vm551_vm0, %v2356_v9  ;;  %2188 = vmatmul.mubr.msk.bf16.vlgmr.msra.gmra.mxu1 %vm551_vm0, %v2357_v10 }
  0x13   :  { %690 = vmatprep.mubr.bf16.mxu0 %v2410_v2  ;;  %850 = vmatprep.mubr.bf16.mxu1 %v2410_v2 }
  0x1a   :  { %2173 = vmatmul.mubr.msk.bf16.gmra.mxu0 %vm551_vm0, %v2358_v11  ;;  %2189 = vmatmul.mubr.msk.bf16.gmra.mxu1 %vm551_vm0, %v2359_v12 }
  0x1b   :  { %700 = vmatprep.mubr.bf16.mxu0 %v2410_v2  ;;  %860 = vmatprep.mubr.bf16.mxu1 %v2410_v2 }
  0x22   :  { %2174 = vmatmul.mubr.msk.bf16.gmra.mxu0 %vm551_vm0, %v2360_v13  ;;  %2190 = vmatmul.mubr.msk.bf16.gmra.mxu1 %vm551_vm0, %v2361_v14 }
  0x23   :  { %710 = vmatprep.mubr.bf16.mxu0 %v2410_v2  ;;  %870 = vmatprep.mubr.bf16.mxu1 %v2410_v2 }
  0x24   :  { %9 = vsyncpa [#allocation4], 0  ;;  %v2362_v15 = vld [vmem:[%s2896_s0 + $0x18] sm:$0xff]   ;;  %v2364_v17 = vld [vmem:[%s2896_s0 + $0x20] sm:$0xff]   ;;  %v1390_v41 = vlaneseq }
  0x25   :  { %v2363_v16 = vld [vmem:[%s2896_s0 + $0x98] sm:$0xff]   ;;  %v2365_v18 = vld [vmem:[%s2896_s0 + $0xa0] sm:$0xff]   ;;  %v2366_v19 = vld [vmem:[%s2896_s0 + $0x28] sm:$0xff]  }
  0x26   :  { %v2367_v20 = vld [vmem:[%s2896_s0 + $0xa8] sm:$0xff]   ;;  %v2368_v21 = vld [vmem:[%s2896_s0 + $0x30] sm:$0xff]   ;;  %v2370_v23 = vld [vmem:[%s2896_s0 + $0x38] sm:$0xff]   ;;  %v1391_v42 = vshrl.u32 %v1390_v41, 7 }
  0x27   :  { %v2369_v22 = vld [vmem:[%s2896_s0 + $0xb0] sm:$0xff]   ;;  %v2371_v24 = vld [vmem:[%s2896_s0 + $0xb8] sm:$0xff]   ;;  %v2372_v25 = vld [vmem:[%s2896_s0 + $0x40] sm:$0xff]  }
  0x28   :  { %v2373_v26 = vld [vmem:[%s2896_s0 + $0xc0] sm:$0xff]   ;;  %v2374_v27 = vld [vmem:[%s2896_s0 + $0x48] sm:$0xff]   ;;  %v2376_v29 = vld [vmem:[%s2896_s0 + $0x50] sm:$0xff]   ;;  %v1392_v43 = vsub.s32 0, %v1391_v42  ;;  %v1396_v45 = vsub.s32 1, %v1391_v42 }
  0x29   :  { %v2375_v28 = vld [vmem:[%s2896_s0 + $0xc8] sm:$0xff]   ;;  %v2377_v30 = vld [vmem:[%s2896_s0 + $0xd0] sm:$0xff]   ;;  %v2378_v31 = vld [vmem:[%s2896_s0 + $0x58] sm:$0xff]  }
  0x2a   :  { %2175 = vmatmul.mubr.msk.bf16.gmra.mxu0 %vm551_vm0, %v2362_v15  ;;  %2191 = vmatmul.mubr.msk.bf16.gmra.mxu1 %vm551_vm0, %v2363_v16  ;;  %v2379_v32 = vld [vmem:[%s2896_s0 + $0xd8] sm:$0xff]   ;;  %v2380_v33 = vld [vmem:[%s2896_s0 + $0x60] sm:$0xff]   ;;  %v2382_v35 = vld [vmem:[%s2896_s0 + $0x68] sm:$0xff]  }
  0x2b   :  { %720 = vmatprep.mubr.bf16.mxu0 %v2410_v2  ;;  %880 = vmatprep.mubr.bf16.mxu1 %v2410_v2  ;;  %v2381_v34 = vld [vmem:[%s2896_s0 + $0xe0] sm:$0xff]   ;;  %v2383_v36 = vld [vmem:[%s2896_s0 + $0xe8] sm:$0xff]   ;;  %v2384_v37 = vld [vmem:[%s2896_s0 + $0x70] sm:$0xff]  }
  0x2c   :  { %v2385_v38 = vld [vmem:[%s2896_s0 + $0xf0] sm:$0xff]   ;;  %v2386_v39 = vld [vmem:[%s2896_s0 + $0x78] sm:$0xff]   ;;  %v1388_v44 = vld [vmem:[%s2898_s2] sm:$0x3] }
  0x2d   :  { %v2387_v40 = vld [vmem:[%s2896_s0 + $0xf8] sm:$0xff]   ;;  %v2626_v46 = vrot.slane %v1388_v44, %v1392_v43  ;;  %v1528_v47 = vld [vmem:[%s2899_s3] sm:$0x3]  ;;  %v2631_v48 = vrot.slane %v1388_v44, %v1396_v45  ;;  %s2411_s0 = smov [#allocation3]  }
  0x2e   :  { %v2634_v52 = vrot.slane %v1528_v47, %v1392_v43  ;;  %v2637_v54 = vrot.slane %v1528_v47, %v1396_v45  ;;  %s2121_s2 = sshll.u32 %s2411_s0, 4  ;;  %s2122_s2 = int_to_ptr.vmem [resolvable:$true] %s2121_s2 }
  0x2f   :  { %s2388_s3 = scalar_lea.vmem %s2122_s2, 8192  ;;  %p2393_p1 = scmp.lt.s32.totalorder %s2122_s2, %s2122_s2 }
  0x30   :  { %p2389_p0 = scmp.ne.s32.totalorder %s2122_s2, %s2388_s3  ;;  %p2394_p2 = scmp.lt.s32.totalorder %s2388_s3, %s2388_s3 }
  0x32   :  { %2176 = vmatmul.mubr.msk.bf16.gmra.mxu0 %vm551_vm0, %v2364_v17  ;;  %2192 = vmatmul.mubr.msk.bf16.gmra.mxu1 %vm551_vm0, %v2365_v18  ;;  %p2395_p3 = por %p2394_p2, %p2393_p1 }
  0x33   :  { %730 = vmatprep.mubr.bf16.mxu0 %v2410_v2  ;;  %890 = vmatprep.mubr.bf16.mxu1 %v2410_v2 }
  0x34   :  { %p2396_p4 = pnand %p2395_p3, %p2389_p0 }
  0x3a   :  { %2177 = vmatmul.mubr.msk.bf16.gmra.mxu0 %vm551_vm0, %v2366_v19  ;;  %2193 = vmatmul.mubr.msk.bf16.gmra.mxu1 %vm551_vm0, %v2367_v20 }
  0x3b   :  { %740 = vmatprep.mubr.bf16.mxu0 %v2410_v2  ;;  %900 = vmatprep.mubr.bf16.mxu1 %v2410_v2 }
  0x42   :  { %2178 = vmatmul.mubr.msk.bf16.gmra.mxu0 %vm551_vm0, %v2368_v21  ;;  %2194 = vmatmul.mubr.msk.bf16.gmra.mxu1 %vm551_vm0, %v2369_v22 }
  0x43   :  { %750 = vmatprep.mubr.bf16.mxu0 %v2410_v2  ;;  %910 = vmatprep.mubr.bf16.mxu1 %v2410_v2 }
  0x4a   :  { %2179 = vmatmul.mubr.msk.bf16.gmra.mxu0 %vm551_vm0, %v2370_v23  ;;  %2195 = vmatmul.mubr.msk.bf16.gmra.mxu1 %vm551_vm0, %v2371_v24 }
  0x4b   :  { %760 = vmatprep.mubr.bf16.mxu0 %v2410_v2  ;;  %920 = vmatprep.mubr.bf16.mxu1 %v2410_v2 }
  0x52   :  { %2180 = vmatmul.mubr.msk.bf16.gmra.mxu0 %vm551_vm0, %v2372_v25  ;;  %2196 = vmatmul.mubr.msk.bf16.gmra.mxu1 %vm551_vm0, %v2373_v26 }
  0x53   :  { %770 = vmatprep.mubr.bf16.mxu0 %v2410_v2  ;;  %930 = vmatprep.mubr.bf16.mxu1 %v2410_v2 }
  0x5a   :  { %2181 = vmatmul.mubr.msk.bf16.gmra.mxu0 %vm551_vm0, %v2374_v27  ;;  %2197 = vmatmul.mubr.msk.bf16.gmra.mxu1 %vm551_vm0, %v2375_v28 }
  0x5b   :  { %780 = vmatprep.mubr.bf16.mxu0 %v2410_v2  ;;  %940 = vmatprep.mubr.bf16.mxu1 %v2410_v2 }
  0x62   :  { %2182 = vmatmul.mubr.msk.bf16.gmra.mxu0 %vm551_vm0, %v2376_v29  ;;  %2198 = vmatmul.mubr.msk.bf16.gmra.mxu1 %vm551_vm0, %v2377_v30 }
  0x63   :  { %790 = vmatprep.mubr.bf16.mxu0 %v2410_v2  ;;  %950 = vmatprep.mubr.bf16.mxu1 %v2410_v2 }
  0x6a   :  { %2183 = vmatmul.mubr.msk.bf16.gmra.mxu0 %vm551_vm0, %v2378_v31  ;;  %2199 = vmatmul.mubr.msk.bf16.gmra.mxu1 %vm551_vm0, %v2379_v32 }
  0x6b   :  { %800 = vmatprep.mubr.bf16.mxu0 %v2410_v2  ;;  %960 = vmatprep.mubr.bf16.mxu1 %v2410_v2 }
  0x72   :  { %2184 = vmatmul.mubr.msk.bf16.gmra.mxu0 %vm551_vm0, %v2380_v33  ;;  %2200 = vmatmul.mubr.msk.bf16.gmra.mxu1 %vm551_vm0, %v2381_v34 }
  0x73   :  { %810 = vmatprep.mubr.bf16.mxu0 %v2410_v2  ;;  %970 = vmatprep.mubr.bf16.mxu1 %v2410_v2 }
  0x7a   :  { %2185 = vmatmul.mubr.msk.bf16.gmra.mxu0 %vm551_vm0, %v2382_v35  ;;  %2201 = vmatmul.mubr.msk.bf16.gmra.mxu1 %vm551_vm0, %v2383_v36 }
  0x7b   :  { %820 = vmatprep.mubr.bf16.mxu0 %v2410_v2  ;;  %980 = vmatprep.mubr.bf16.mxu1 %v2410_v2 }
  0x82   :  { %2186 = vmatmul.mubr.msk.bf16.gmra.mxu0 %vm551_vm0, %v2384_v37  ;;  %2202 = vmatmul.mubr.msk.bf16.gmra.mxu1 %vm551_vm0, %v2385_v38 }
  0x83   :  { %830 = vmatprep.mubr.bf16.mxu0 %v2410_v2  ;;  %990 = vmatprep.mubr.bf16.mxu1 %v2410_v2 }
  0x8a   :  { %2187 = vmatmul.mubr.msk.bf16.gmra.mxu0 %vm551_vm0, %v2386_v39  ;;  %2203 = vmatmul.mubr.msk.bf16.gmra.mxu1 %vm551_vm0, %v2387_v40 }
  0xd2   :  { %v682_v49 = vpop.f32.mrf.mxu0  ;;  %v842_v50 = vpop.f32.mrf.mxu1 }
  0xd3   :  { %v1400_v51 = vmul.f32 %v2626_v46, %v682_v49  ;;  %v1464_v53 = vmul.f32 %v2626_v46, %v842_v50 }
  0xd4   :  { %v684_v55 = vpop.f32.mrf.mxu0  ;;  %v844_v56 = vpop.f32.mrf.mxu1 }
  0xd5   :  { %v1401_v57 = vmul.f32 %v2631_v48, %v684_v55  ;;  %v1465_v58 = vmul.f32 %v2631_v48, %v844_v56  ;;  %v1540_v61 = vadd.f32 %v2634_v52, %v1400_v51  ;;  %v1604_v62 = vadd.f32 %v2634_v52, %v1464_v53 }
  0xd6   :  { %v686_v59 = vpop.f32.mrf.mxu0  ;;  %v846_v60 = vpop.f32.mrf.mxu1 }
  0xd7   :  { %v1541_v63 = vadd.f32 %v2637_v54, %v1401_v57  ;;  %v1605_v0 = vadd.f32 %v2637_v54, %v1465_v58  ;;  %v1402_v1 = vmul.f32 %v2626_v46, %v686_v59  ;;  %v1466_v2 = vmul.f32 %v2626_v46, %v846_v60 }
  0xd8   :  { %v688_v3 = vpop.f32.mrf.mxu0  ;;  %v848_v4 = vpop.f32.mrf.mxu1 }
  0xd9   :  { %v2268_v5 = vpack.c.bf16 %v1541_v63, %v1540_v61  ;;  %v2300_v6 = vpack.c.bf16 %v1605_v0, %v1604_v62  ;;  %v1403_v7 = vmul.f32 %v2631_v48, %v688_v3  ;;  %v1467_v8 = vmul.f32 %v2631_v48, %v848_v4 }
  0xda   :  { %v692_v9 = vpop.f32.mrf.mxu0  ;;  %v852_v10 = vpop.f32.mrf.mxu1  ;;  %v1542_v13 = vadd.f32 %v2634_v52, %v1402_v1  ;;  %v1606_v14 = vadd.f32 %v2634_v52, %v1466_v2 }
  0xdb   :  { %2052 = vst [vmem:[#allocation3] sm:$0xff] %v2268_v5  ;;  %2084 = vst [vmem:[#allocation3 + $0x100] sm:$0xff] %v2300_v6  ;;  %v1404_v11 = vmul.f32 %v2626_v46, %v692_v9  ;;  %v1468_v12 = vmul.f32 %v2626_v46, %v852_v10  ;;  %v1543_v15 = vadd.f32 %v2637_v54, %v1403_v7 }
  0xdc   :  { %v1607_v16 = vadd.f32 %v2637_v54, %v1467_v8  ;;  %v694_v17 = vpop.f32.mrf.mxu0  ;;  %v854_v18 = vpop.f32.mrf.mxu1 }
  0xdd   :  { %v1405_v19 = vmul.f32 %v2631_v48, %v694_v17  ;;  %v1469_v20 = vmul.f32 %v2631_v48, %v854_v18  ;;  %v2269_v21 = vpack.c.bf16 %v1543_v15, %v1542_v13  ;;  %v1544_v25 = vadd.f32 %v2634_v52, %v1404_v11 }
  0xde   :  { %v2301_v22 = vpack.c.bf16 %v1607_v16, %v1606_v14  ;;  %v696_v23 = vpop.f32.mrf.mxu0  ;;  %v856_v24 = vpop.f32.mrf.mxu1  ;;  %v1608_v26 = vadd.f32 %v2634_v52, %v1468_v12 }
  0xdf   :  { %v1545_v27 = vadd.f32 %v2637_v54, %v1405_v19  ;;  %v1609_v28 = vadd.f32 %v2637_v54, %v1469_v20  ;;  %2053 = vst [vmem:[#allocation3 + $0x8] sm:$0xff] %v2269_v21  ;;  %v1406_v29 = vmul.f32 %v2626_v46, %v696_v23  ;;  %v1470_v30 = vmul.f32 %v2626_v46, %v856_v24 }
  0xe0   :  { %2085 = vst [vmem:[#allocation3 + $0x108] sm:$0xff] %v2301_v22  ;;  %v698_v31 = vpop.f32.mrf.mxu0  ;;  %v858_v32 = vpop.f32.mrf.mxu1 }
  0xe1   :  { %v2270_v33 = vpack.c.bf16 %v1545_v27, %v1544_v25  ;;  %v2302_v34 = vpack.c.bf16 %v1609_v28, %v1608_v26  ;;  %v1407_v35 = vmul.f32 %v2631_v48, %v698_v31  ;;  %v1471_v36 = vmul.f32 %v2631_v48, %v858_v32 }
  0xe2   :  { %v702_v37 = vpop.f32.mrf.mxu0  ;;  %v862_v38 = vpop.f32.mrf.mxu1  ;;  %v1546_v41 = vadd.f32 %v2634_v52, %v1406_v29  ;;  %v1610_v42 = vadd.f32 %v2634_v52, %v1470_v30 }
  0xe3   :  { %2054 = vst [vmem:[#allocation3 + $0x10] sm:$0xff] %v2270_v33  ;;  %2086 = vst [vmem:[#allocation3 + $0x110] sm:$0xff] %v2302_v34  ;;  %v1408_v39 = vmul.f32 %v2626_v46, %v702_v37  ;;  %v1472_v40 = vmul.f32 %v2626_v46, %v862_v38  ;;  %v1547_v43 = vadd.f32 %v2637_v54, %v1407_v35 }
  0xe4   :  { %v1611_v44 = vadd.f32 %v2637_v54, %v1471_v36  ;;  %v704_v45 = vpop.f32.mrf.mxu0  ;;  %v864_v47 = vpop.f32.mrf.mxu1 }
  0xe5   :  { %v1409_v49 = vmul.f32 %v2631_v48, %v704_v45  ;;  %v1473_v50 = vmul.f32 %v2631_v48, %v864_v47  ;;  %v2271_v51 = vpack.c.bf16 %v1547_v43, %v1546_v41  ;;  %v1548_v57 = vadd.f32 %v2634_v52, %v1408_v39 }
  0xe6   :  { %v2303_v53 = vpack.c.bf16 %v1611_v44, %v1610_v42  ;;  %v706_v55 = vpop.f32.mrf.mxu0  ;;  %v866_v56 = vpop.f32.mrf.mxu1  ;;  %v1612_v58 = vadd.f32 %v2634_v52, %v1472_v40 }
  0xe7   :  { %v1549_v59 = vadd.f32 %v2637_v54, %v1409_v49  ;;  %v1613_v60 = vadd.f32 %v2637_v54, %v1473_v50  ;;  %2055 = vst [vmem:[#allocation3 + $0x18] sm:$0xff] %v2271_v51  ;;  %v1410_v61 = vmul.f32 %v2626_v46, %v706_v55  ;;  %v1474_v62 = vmul.f32 %v2626_v46, %v866_v56 }
  0xe8   :  { %2087 = vst [vmem:[#allocation3 + $0x118] sm:$0xff] %v2303_v53  ;;  %v708_v63 = vpop.f32.mrf.mxu0  ;;  %v868_v0 = vpop.f32.mrf.mxu1 }
  0xe9   :  { %v2272_v1 = vpack.c.bf16 %v1549_v59, %v1548_v57  ;;  %v2304_v2 = vpack.c.bf16 %v1613_v60, %v1612_v58  ;;  %v1411_v3 = vmul.f32 %v2631_v48, %v708_v63  ;;  %v1475_v4 = vmul.f32 %v2631_v48, %v868_v0 }
  0xea   :  { %v712_v5 = vpop.f32.mrf.mxu0  ;;  %v872_v6 = vpop.f32.mrf.mxu1  ;;  %v1550_v9 = vadd.f32 %v2634_v52, %v1410_v61  ;;  %v1614_v10 = vadd.f32 %v2634_v52, %v1474_v62 }
  0xeb   :  { %2056 = vst [vmem:[#allocation3 + $0x20] sm:$0xff] %v2272_v1  ;;  %2088 = vst [vmem:[#allocation3 + $0x120] sm:$0xff] %v2304_v2  ;;  %v1412_v7 = vmul.f32 %v2626_v46, %v712_v5  ;;  %v1476_v8 = vmul.f32 %v2626_v46, %v872_v6  ;;  %v1551_v11 = vadd.f32 %v2637_v54, %v1411_v3 }
  0xec   :  { %v1615_v12 = vadd.f32 %v2637_v54, %v1475_v4  ;;  %v714_v13 = vpop.f32.mrf.mxu0  ;;  %v874_v14 = vpop.f32.mrf.mxu1 }
  0xed   :  { %v1413_v15 = vmul.f32 %v2631_v48, %v714_v13  ;;  %v1477_v16 = vmul.f32 %v2631_v48, %v874_v14  ;;  %v2273_v17 = vpack.c.bf16 %v1551_v11, %v1550_v9  ;;  %v1552_v21 = vadd.f32 %v2634_v52, %v1412_v7 }
  0xee   :  { %v2305_v18 = vpack.c.bf16 %v1615_v12, %v1614_v10  ;;  %v716_v19 = vpop.f32.mrf.mxu0  ;;  %v876_v20 = vpop.f32.mrf.mxu1  ;;  %v1616_v22 = vadd.f32 %v2634_v52, %v1476_v8 }
  0xef   :  { %v1553_v23 = vadd.f32 %v2637_v54, %v1413_v15  ;;  %v1617_v24 = vadd.f32 %v2637_v54, %v1477_v16  ;;  %2057 = vst [vmem:[#allocation3 + $0x28] sm:$0xff] %v2273_v17  ;;  %v1414_v25 = vmul.f32 %v2626_v46, %v716_v19  ;;  %v1478_v26 = vmul.f32 %v2626_v46, %v876_v20 }
  0xf0   :  { %2089 = vst [vmem:[#allocation3 + $0x128] sm:$0xff] %v2305_v18  ;;  %v718_v27 = vpop.f32.mrf.mxu0  ;;  %v878_v28 = vpop.f32.mrf.mxu1 }
  0xf1   :  { %v2274_v29 = vpack.c.bf16 %v1553_v23, %v1552_v21  ;;  %v2306_v30 = vpack.c.bf16 %v1617_v24, %v1616_v22  ;;  %v1415_v31 = vmul.f32 %v2631_v48, %v718_v27  ;;  %v1479_v32 = vmul.f32 %v2631_v48, %v878_v28 }
  0xf2   :  { %v722_v33 = vpop.f32.mrf.mxu0  ;;  %v882_v34 = vpop.f32.mrf.mxu1  ;;  %v1554_v37 = vadd.f32 %v2634_v52, %v1414_v25  ;;  %v1618_v38 = vadd.f32 %v2634_v52, %v1478_v26 }
  0xf3   :  { %2058 = vst [vmem:[#allocation3 + $0x30] sm:$0xff] %v2274_v29  ;;  %2090 = vst [vmem:[#allocation3 + $0x130] sm:$0xff] %v2306_v30  ;;  %v1416_v35 = vmul.f32 %v2626_v46, %v722_v33  ;;  %v1480_v36 = vmul.f32 %v2626_v46, %v882_v34  ;;  %v1555_v39 = vadd.f32 %v2637_v54, %v1415_v31 }
  0xf4   :  { %v1619_v40 = vadd.f32 %v2637_v54, %v1479_v32  ;;  %v724_v41 = vpop.f32.mrf.mxu0  ;;  %v884_v42 = vpop.f32.mrf.mxu1 }
  0xf5   :  { %v1417_v43 = vmul.f32 %v2631_v48, %v724_v41  ;;  %v1481_v44 = vmul.f32 %v2631_v48, %v884_v42  ;;  %v2275_v45 = vpack.c.bf16 %v1555_v39, %v1554_v37  ;;  %v1556_v51 = vadd.f32 %v2634_v52, %v1416_v35 }
  0xf6   :  { %v2307_v47 = vpack.c.bf16 %v1619_v40, %v1618_v38  ;;  %v726_v49 = vpop.f32.mrf.mxu0  ;;  %v886_v50 = vpop.f32.mrf.mxu1  ;;  %v1620_v53 = vadd.f32 %v2634_v52, %v1480_v36 }
  0xf7   :  { %v1557_v55 = vadd.f32 %v2637_v54, %v1417_v43  ;;  %v1621_v56 = vadd.f32 %v2637_v54, %v1481_v44  ;;  %2059 = vst [vmem:[#allocation3 + $0x38] sm:$0xff] %v2275_v45  ;;  %v1418_v57 = vmul.f32 %v2626_v46, %v726_v49  ;;  %v1482_v58 = vmul.f32 %v2626_v46, %v886_v50 }
  0xf8   :  { %2091 = vst [vmem:[#allocation3 + $0x138] sm:$0xff] %v2307_v47  ;;  %v728_v59 = vpop.f32.mrf.mxu0  ;;  %v888_v60 = vpop.f32.mrf.mxu1 }
  0xf9   :  { %v2276_v61 = vpack.c.bf16 %v1557_v55, %v1556_v51  ;;  %v2308_v62 = vpack.c.bf16 %v1621_v56, %v1620_v53  ;;  %v1419_v63 = vmul.f32 %v2631_v48, %v728_v59  ;;  %v1483_v0 = vmul.f32 %v2631_v48, %v888_v60 }
  0xfa   :  { %v732_v1 = vpop.f32.mrf.mxu0  ;;  %v892_v2 = vpop.f32.mrf.mxu1  ;;  %v1558_v5 = vadd.f32 %v2634_v52, %v1418_v57  ;;  %v1622_v6 = vadd.f32 %v2634_v52, %v1482_v58 }
  0xfb   :  { %2060 = vst [vmem:[#allocation3 + $0x40] sm:$0xff] %v2276_v61  ;;  %2092 = vst [vmem:[#allocation3 + $0x140] sm:$0xff] %v2308_v62  ;;  %v1420_v3 = vmul.f32 %v2626_v46, %v732_v1  ;;  %v1484_v4 = vmul.f32 %v2626_v46, %v892_v2  ;;  %v1559_v7 = vadd.f32 %v2637_v54, %v1419_v63 }
  0xfc   :  { %v1623_v8 = vadd.f32 %v2637_v54, %v1483_v0  ;;  %v734_v9 = vpop.f32.mrf.mxu0  ;;  %v894_v10 = vpop.f32.mrf.mxu1 }
  0xfd   :  { %v1421_v11 = vmul.f32 %v2631_v48, %v734_v9  ;;  %v1485_v12 = vmul.f32 %v2631_v48, %v894_v10  ;;  %v2277_v13 = vpack.c.bf16 %v1559_v7, %v1558_v5  ;;  %v1560_v17 = vadd.f32 %v2634_v52, %v1420_v3 }
  0xfe   :  { %v2309_v14 = vpack.c.bf16 %v1623_v8, %v1622_v6  ;;  %v736_v15 = vpop.f32.mrf.mxu0  ;;  %v896_v16 = vpop.f32.mrf.mxu1  ;;  %v1624_v18 = vadd.f32 %v2634_v52, %v1484_v4 }
  0xff   :  { %v1561_v19 = vadd.f32 %v2637_v54, %v1421_v11  ;;  %v1625_v20 = vadd.f32 %v2637_v54, %v1485_v12  ;;  %2061 = vst [vmem:[#allocation3 + $0x48] sm:$0xff] %v2277_v13  ;;  %v1422_v21 = vmul.f32 %v2626_v46, %v736_v15  ;;  %v1486_v22 = vmul.f32 %v2626_v46, %v896_v16 }
 0x100   :  { %2093 = vst [vmem:[#allocation3 + $0x148] sm:$0xff] %v2309_v14  ;;  %v738_v23 = vpop.f32.mrf.mxu0  ;;  %v898_v24 = vpop.f32.mrf.mxu1 }
 0x101   :  { %v2278_v25 = vpack.c.bf16 %v1561_v19, %v1560_v17  ;;  %v2310_v26 = vpack.c.bf16 %v1625_v20, %v1624_v18  ;;  %v1423_v27 = vmul.f32 %v2631_v48, %v738_v23  ;;  %v1487_v28 = vmul.f32 %v2631_v48, %v898_v24 }
 0x102   :  { %v742_v29 = vpop.f32.mrf.mxu0  ;;  %v902_v30 = vpop.f32.mrf.mxu1  ;;  %v1562_v33 = vadd.f32 %v2634_v52, %v1422_v21  ;;  %v1626_v34 = vadd.f32 %v2634_v52, %v1486_v22 }
 0x103   :  { %2062 = vst [vmem:[#allocation3 + $0x50] sm:$0xff] %v2278_v25  ;;  %2094 = vst [vmem:[#allocation3 + $0x150] sm:$0xff] %v2310_v26  ;;  %v1424_v31 = vmul.f32 %v2626_v46, %v742_v29  ;;  %v1488_v32 = vmul.f32 %v2626_v46, %v902_v30  ;;  %v1563_v35 = vadd.f32 %v2637_v54, %v1423_v27 }
 0x104   :  { %v1627_v36 = vadd.f32 %v2637_v54, %v1487_v28  ;;  %v744_v37 = vpop.f32.mrf.mxu0  ;;  %v904_v38 = vpop.f32.mrf.mxu1 }
 0x105   :  { %v1425_v39 = vmul.f32 %v2631_v48, %v744_v37  ;;  %v1489_v40 = vmul.f32 %v2631_v48, %v904_v38  ;;  %v2279_v41 = vpack.c.bf16 %v1563_v35, %v1562_v33  ;;  %v1564_v45 = vadd.f32 %v2634_v52, %v1424_v31 }
 0x106   :  { %v2311_v42 = vpack.c.bf16 %v1627_v36, %v1626_v34  ;;  %v746_v43 = vpop.f32.mrf.mxu0  ;;  %v906_v44 = vpop.f32.mrf.mxu1  ;;  %v1628_v47 = vadd.f32 %v2634_v52, %v1488_v32 }
 0x107   :  { %v1565_v49 = vadd.f32 %v2637_v54, %v1425_v39  ;;  %v1629_v50 = vadd.f32 %v2637_v54, %v1489_v40  ;;  %2063 = vst [vmem:[#allocation3 + $0x58] sm:$0xff] %v2279_v41  ;;  %v1426_v51 = vmul.f32 %v2626_v46, %v746_v43  ;;  %v1490_v53 = vmul.f32 %v2626_v46, %v906_v44 }
 0x108   :  { %2095 = vst [vmem:[#allocation3 + $0x158] sm:$0xff] %v2311_v42  ;;  %v748_v55 = vpop.f32.mrf.mxu0  ;;  %v908_v56 = vpop.f32.mrf.mxu1 }
 0x109   :  { %v2280_v57 = vpack.c.bf16 %v1565_v49, %v1564_v45  ;;  %v2312_v58 = vpack.c.bf16 %v1629_v50, %v1628_v47  ;;  %v1427_v59 = vmul.f32 %v2631_v48, %v748_v55  ;;  %v1491_v60 = vmul.f32 %v2631_v48, %v908_v56 }
 0x10a   :  { %v752_v61 = vpop.f32.mrf.mxu0  ;;  %v912_v62 = vpop.f32.mrf.mxu1  ;;  %v1566_v1 = vadd.f32 %v2634_v52, %v1426_v51  ;;  %v1630_v2 = vadd.f32 %v2634_v52, %v1490_v53 }
 0x10b   :  { %2064 = vst [vmem:[#allocation3 + $0x60] sm:$0xff] %v2280_v57  ;;  %2096 = vst [vmem:[#allocation3 + $0x160] sm:$0xff] %v2312_v58  ;;  %v1428_v63 = vmul.f32 %v2626_v46, %v752_v61  ;;  %v1492_v0 = vmul.f32 %v2626_v46, %v912_v62  ;;  %v1567_v3 = vadd.f32 %v2637_v54, %v1427_v59 }
 0x10c   :  { %v1631_v4 = vadd.f32 %v2637_v54, %v1491_v60  ;;  %v754_v5 = vpop.f32.mrf.mxu0  ;;  %v914_v6 = vpop.f32.mrf.mxu1 }
 0x10d   :  { %v1429_v7 = vmul.f32 %v2631_v48, %v754_v5  ;;  %v1493_v8 = vmul.f32 %v2631_v48, %v914_v6  ;;  %v2281_v9 = vpack.c.bf16 %v1567_v3, %v1566_v1  ;;  %v1568_v13 = vadd.f32 %v2634_v52, %v1428_v63 }
 0x10e   :  { %v2313_v10 = vpack.c.bf16 %v1631_v4, %v1630_v2  ;;  %v756_v11 = vpop.f32.mrf.mxu0  ;;  %v916_v12 = vpop.f32.mrf.mxu1  ;;  %v1632_v14 = vadd.f32 %v2634_v52, %v1492_v0 }
 0x10f   :  { %v1569_v15 = vadd.f32 %v2637_v54, %v1429_v7  ;;  %v1633_v16 = vadd.f32 %v2637_v54, %v1493_v8  ;;  %2065 = vst [vmem:[#allocation3 + $0x68] sm:$0xff] %v2281_v9  ;;  %v1430_v17 = vmul.f32 %v2626_v46, %v756_v11  ;;  %v1494_v18 = vmul.f32 %v2626_v46, %v916_v12 }
 0x110   :  { %2097 = vst [vmem:[#allocation3 + $0x168] sm:$0xff] %v2313_v10  ;;  %v758_v19 = vpop.f32.mrf.mxu0  ;;  %v918_v20 = vpop.f32.mrf.mxu1 }
 0x111   :  { %v2282_v21 = vpack.c.bf16 %v1569_v15, %v1568_v13  ;;  %v2314_v22 = vpack.c.bf16 %v1633_v16, %v1632_v14  ;;  %v1431_v23 = vmul.f32 %v2631_v48, %v758_v19  ;;  %v1495_v24 = vmul.f32 %v2631_v48, %v918_v20 }
 0x112   :  { %v762_v25 = vpop.f32.mrf.mxu0  ;;  %v922_v26 = vpop.f32.mrf.mxu1  ;;  %v1570_v29 = vadd.f32 %v2634_v52, %v1430_v17  ;;  %v1634_v30 = vadd.f32 %v2634_v52, %v1494_v18 }
 0x113   :  { %2066 = vst [vmem:[#allocation3 + $0x70] sm:$0xff] %v2282_v21  ;;  %2098 = vst [vmem:[#allocation3 + $0x170] sm:$0xff] %v2314_v22  ;;  %v1432_v27 = vmul.f32 %v2626_v46, %v762_v25  ;;  %v1496_v28 = vmul.f32 %v2626_v46, %v922_v26  ;;  %v1571_v31 = vadd.f32 %v2637_v54, %v1431_v23 }
 0x114   :  { %v1635_v32 = vadd.f32 %v2637_v54, %v1495_v24  ;;  %v764_v33 = vpop.f32.mrf.mxu0  ;;  %v924_v34 = vpop.f32.mrf.mxu1 }
 0x115   :  { %v1433_v35 = vmul.f32 %v2631_v48, %v764_v33  ;;  %v1497_v36 = vmul.f32 %v2631_v48, %v924_v34  ;;  %v2283_v37 = vpack.c.bf16 %v1571_v31, %v1570_v29  ;;  %v1572_v41 = vadd.f32 %v2634_v52, %v1432_v27 }
 0x116   :  { %v2315_v38 = vpack.c.bf16 %v1635_v32, %v1634_v30  ;;  %v766_v39 = vpop.f32.mrf.mxu0  ;;  %v926_v40 = vpop.f32.mrf.mxu1  ;;  %v1636_v42 = vadd.f32 %v2634_v52, %v1496_v28 }
 0x117   :  { %v1573_v43 = vadd.f32 %v2637_v54, %v1433_v35  ;;  %v1637_v44 = vadd.f32 %v2637_v54, %v1497_v36  ;;  %2067 = vst [vmem:[#allocation3 + $0x78] sm:$0xff] %v2283_v37  ;;  %v1434_v45 = vmul.f32 %v2626_v46, %v766_v39  ;;  %v1498_v47 = vmul.f32 %v2626_v46, %v926_v40 }
 0x118   :  { %2099 = vst [vmem:[#allocation3 + $0x178] sm:$0xff] %v2315_v38  ;;  %v768_v49 = vpop.f32.mrf.mxu0  ;;  %v928_v50 = vpop.f32.mrf.mxu1 }
 0x119   :  { %v2284_v51 = vpack.c.bf16 %v1573_v43, %v1572_v41  ;;  %v2316_v53 = vpack.c.bf16 %v1637_v44, %v1636_v42  ;;  %v1435_v55 = vmul.f32 %v2631_v48, %v768_v49  ;;  %v1499_v56 = vmul.f32 %v2631_v48, %v928_v50 }
 0x11a   :  { %v772_v57 = vpop.f32.mrf.mxu0  ;;  %v932_v58 = vpop.f32.mrf.mxu1  ;;  %v1574_v61 = vadd.f32 %v2634_v52, %v1434_v45  ;;  %v1638_v62 = vadd.f32 %v2634_v52, %v1498_v47 }
 0x11b   :  { %2068 = vst [vmem:[#allocation3 + $0x80] sm:$0xff] %v2284_v51  ;;  %2100 = vst [vmem:[#allocation3 + $0x180] sm:$0xff] %v2316_v53  ;;  %v1436_v59 = vmul.f32 %v2626_v46, %v772_v57  ;;  %v1500_v60 = vmul.f32 %v2626_v46, %v932_v58  ;;  %v1575_v63 = vadd.f32 %v2637_v54, %v1435_v55 }
 0x11c   :  { %v1639_v0 = vadd.f32 %v2637_v54, %v1499_v56  ;;  %v774_v1 = vpop.f32.mrf.mxu0  ;;  %v934_v2 = vpop.f32.mrf.mxu1 }
 0x11d   :  { %v1437_v3 = vmul.f32 %v2631_v48, %v774_v1  ;;  %v1501_v4 = vmul.f32 %v2631_v48, %v934_v2  ;;  %v2285_v5 = vpack.c.bf16 %v1575_v63, %v1574_v61  ;;  %v1576_v9 = vadd.f32 %v2634_v52, %v1436_v59 }
 0x11e   :  { %v2317_v6 = vpack.c.bf16 %v1639_v0, %v1638_v62  ;;  %v776_v7 = vpop.f32.mrf.mxu0  ;;  %v936_v8 = vpop.f32.mrf.mxu1  ;;  %v1640_v10 = vadd.f32 %v2634_v52, %v1500_v60 }
 0x11f   :  { %v1577_v11 = vadd.f32 %v2637_v54, %v1437_v3  ;;  %v1641_v12 = vadd.f32 %v2637_v54, %v1501_v4  ;;  %2069 = vst [vmem:[#allocation3 + $0x88] sm:$0xff] %v2285_v5  ;;  %v1438_v13 = vmul.f32 %v2626_v46, %v776_v7  ;;  %v1502_v14 = vmul.f32 %v2626_v46, %v936_v8 }
 0x120   :  { %2101 = vst [vmem:[#allocation3 + $0x188] sm:$0xff] %v2317_v6  ;;  %v778_v15 = vpop.f32.mrf.mxu0  ;;  %v938_v16 = vpop.f32.mrf.mxu1 }
 0x121   :  { %v2286_v17 = vpack.c.bf16 %v1577_v11, %v1576_v9  ;;  %v2318_v18 = vpack.c.bf16 %v1641_v12, %v1640_v10  ;;  %v1439_v19 = vmul.f32 %v2631_v48, %v778_v15  ;;  %v1503_v20 = vmul.f32 %v2631_v48, %v938_v16 }
 0x122   :  { %v782_v21 = vpop.f32.mrf.mxu0  ;;  %v942_v22 = vpop.f32.mrf.mxu1  ;;  %v1578_v25 = vadd.f32 %v2634_v52, %v1438_v13  ;;  %v1642_v26 = vadd.f32 %v2634_v52, %v1502_v14 }
 0x123   :  { %2070 = vst [vmem:[#allocation3 + $0x90] sm:$0xff] %v2286_v17  ;;  %2102 = vst [vmem:[#allocation3 + $0x190] sm:$0xff] %v2318_v18  ;;  %v1440_v23 = vmul.f32 %v2626_v46, %v782_v21  ;;  %v1504_v24 = vmul.f32 %v2626_v46, %v942_v22  ;;  %v1579_v27 = vadd.f32 %v2637_v54, %v1439_v19 }
 0x124   :  { %v1643_v28 = vadd.f32 %v2637_v54, %v1503_v20  ;;  %v784_v29 = vpop.f32.mrf.mxu0  ;;  %v944_v30 = vpop.f32.mrf.mxu1 }
 0x125   :  { %v1441_v31 = vmul.f32 %v2631_v48, %v784_v29  ;;  %v1505_v32 = vmul.f32 %v2631_v48, %v944_v30  ;;  %v2287_v33 = vpack.c.bf16 %v1579_v27, %v1578_v25  ;;  %v1580_v37 = vadd.f32 %v2634_v52, %v1440_v23 }
 0x126   :  { %v2319_v34 = vpack.c.bf16 %v1643_v28, %v1642_v26  ;;  %v786_v35 = vpop.f32.mrf.mxu0  ;;  %v946_v36 = vpop.f32.mrf.mxu1  ;;  %v1644_v38 = vadd.f32 %v2634_v52, %v1504_v24 }
 0x127   :  { %v1581_v39 = vadd.f32 %v2637_v54, %v1441_v31  ;;  %v1645_v40 = vadd.f32 %v2637_v54, %v1505_v32  ;;  %2071 = vst [vmem:[#allocation3 + $0x98] sm:$0xff] %v2287_v33  ;;  %v1442_v41 = vmul.f32 %v2626_v46, %v786_v35  ;;  %v1506_v42 = vmul.f32 %v2626_v46, %v946_v36 }
 0x128   :  { %2103 = vst [vmem:[#allocation3 + $0x198] sm:$0xff] %v2319_v34  ;;  %v788_v43 = vpop.f32.mrf.mxu0  ;;  %v948_v44 = vpop.f32.mrf.mxu1 }
 0x129   :  { %v2288_v45 = vpack.c.bf16 %v1581_v39, %v1580_v37  ;;  %v2320_v47 = vpack.c.bf16 %v1645_v40, %v1644_v38  ;;  %v1443_v49 = vmul.f32 %v2631_v48, %v788_v43  ;;  %v1507_v50 = vmul.f32 %v2631_v48, %v948_v44 }
 0x12a   :  { %v792_v51 = vpop.f32.mrf.mxu0  ;;  %v952_v53 = vpop.f32.mrf.mxu1  ;;  %v1582_v57 = vadd.f32 %v2634_v52, %v1442_v41  ;;  %v1646_v58 = vadd.f32 %v2634_v52, %v1506_v42 }
 0x12b   :  { %2072 = vst [vmem:[#allocation3 + $0xa0] sm:$0xff] %v2288_v45  ;;  %2104 = vst [vmem:[#allocation3 + $0x1a0] sm:$0xff] %v2320_v47  ;;  %v1444_v55 = vmul.f32 %v2626_v46, %v792_v51  ;;  %v1508_v56 = vmul.f32 %v2626_v46, %v952_v53  ;;  %v1583_v59 = vadd.f32 %v2637_v54, %v1443_v49 }
 0x12c   :  { %v1647_v60 = vadd.f32 %v2637_v54, %v1507_v50  ;;  %v794_v61 = vpop.f32.mrf.mxu0  ;;  %v954_v62 = vpop.f32.mrf.mxu1 }
 0x12d   :  { %v1445_v63 = vmul.f32 %v2631_v48, %v794_v61  ;;  %v1509_v0 = vmul.f32 %v2631_v48, %v954_v62  ;;  %v2289_v1 = vpack.c.bf16 %v1583_v59, %v1582_v57  ;;  %v1584_v5 = vadd.f32 %v2634_v52, %v1444_v55 }
 0x12e   :  { %v2321_v2 = vpack.c.bf16 %v1647_v60, %v1646_v58  ;;  %v796_v3 = vpop.f32.mrf.mxu0  ;;  %v956_v4 = vpop.f32.mrf.mxu1  ;;  %v1648_v6 = vadd.f32 %v2634_v52, %v1508_v56 }
 0x12f   :  { %v1585_v7 = vadd.f32 %v2637_v54, %v1445_v63  ;;  %v1649_v8 = vadd.f32 %v2637_v54, %v1509_v0  ;;  %2073 = vst [vmem:[#allocation3 + $0xa8] sm:$0xff] %v2289_v1  ;;  %v1446_v9 = vmul.f32 %v2626_v46, %v796_v3  ;;  %v1510_v10 = vmul.f32 %v2626_v46, %v956_v4 }
 0x130   :  { %2105 = vst [vmem:[#allocation3 + $0x1a8] sm:$0xff] %v2321_v2  ;;  %v798_v11 = vpop.f32.mrf.mxu0  ;;  %v958_v12 = vpop.f32.mrf.mxu1 }
 0x131   :  { %v2290_v13 = vpack.c.bf16 %v1585_v7, %v1584_v5  ;;  %v2322_v14 = vpack.c.bf16 %v1649_v8, %v1648_v6  ;;  %v1447_v15 = vmul.f32 %v2631_v48, %v798_v11  ;;  %v1511_v16 = vmul.f32 %v2631_v48, %v958_v12 }
 0x132   :  { %v802_v17 = vpop.f32.mrf.mxu0  ;;  %v962_v18 = vpop.f32.mrf.mxu1  ;;  %v1586_v21 = vadd.f32 %v2634_v52, %v1446_v9  ;;  %v1650_v22 = vadd.f32 %v2634_v52, %v1510_v10 }
 0x133   :  { %2074 = vst [vmem:[#allocation3 + $0xb0] sm:$0xff] %v2290_v13  ;;  %2106 = vst [vmem:[#allocation3 + $0x1b0] sm:$0xff] %v2322_v14  ;;  %v1448_v19 = vmul.f32 %v2626_v46, %v802_v17  ;;  %v1512_v20 = vmul.f32 %v2626_v46, %v962_v18  ;;  %v1587_v23 = vadd.f32 %v2637_v54, %v1447_v15 }
 0x134   :  { %v1651_v24 = vadd.f32 %v2637_v54, %v1511_v16  ;;  %v804_v25 = vpop.f32.mrf.mxu0  ;;  %v964_v26 = vpop.f32.mrf.mxu1 }
 0x135   :  { %v1449_v27 = vmul.f32 %v2631_v48, %v804_v25  ;;  %v1513_v28 = vmul.f32 %v2631_v48, %v964_v26  ;;  %v2291_v29 = vpack.c.bf16 %v1587_v23, %v1586_v21  ;;  %v1588_v33 = vadd.f32 %v2634_v52, %v1448_v19 }
 0x136   :  { %v2323_v30 = vpack.c.bf16 %v1651_v24, %v1650_v22  ;;  %v806_v31 = vpop.f32.mrf.mxu0  ;;  %v966_v32 = vpop.f32.mrf.mxu1  ;;  %v1652_v34 = vadd.f32 %v2634_v52, %v1512_v20 }
 0x137   :  { %v1589_v35 = vadd.f32 %v2637_v54, %v1449_v27  ;;  %v1653_v36 = vadd.f32 %v2637_v54, %v1513_v28  ;;  %2075 = vst [vmem:[#allocation3 + $0xb8] sm:$0xff] %v2291_v29  ;;  %v1450_v37 = vmul.f32 %v2626_v46, %v806_v31  ;;  %v1514_v38 = vmul.f32 %v2626_v46, %v966_v32 }
 0x138   :  { %2107 = vst [vmem:[#allocation3 + $0x1b8] sm:$0xff] %v2323_v30  ;;  %v808_v39 = vpop.f32.mrf.mxu0  ;;  %v968_v40 = vpop.f32.mrf.mxu1 }
 0x139   :  { %v2292_v41 = vpack.c.bf16 %v1589_v35, %v1588_v33  ;;  %v2324_v42 = vpack.c.bf16 %v1653_v36, %v1652_v34  ;;  %v1451_v43 = vmul.f32 %v2631_v48, %v808_v39  ;;  %v1515_v44 = vmul.f32 %v2631_v48, %v968_v40 }
 0x13a   :  { %v812_v45 = vpop.f32.mrf.mxu0  ;;  %v972_v47 = vpop.f32.mrf.mxu1  ;;  %v1590_v51 = vadd.f32 %v2634_v52, %v1450_v37  ;;  %v1654_v53 = vadd.f32 %v2634_v52, %v1514_v38 }
 0x13b   :  { %2076 = vst [vmem:[#allocation3 + $0xc0] sm:$0xff] %v2292_v41  ;;  %2108 = vst [vmem:[#allocation3 + $0x1c0] sm:$0xff] %v2324_v42  ;;  %v1452_v49 = vmul.f32 %v2626_v46, %v812_v45  ;;  %v1516_v50 = vmul.f32 %v2626_v46, %v972_v47  ;;  %v1591_v55 = vadd.f32 %v2637_v54, %v1451_v43 }
 0x13c   :  { %v1655_v56 = vadd.f32 %v2637_v54, %v1515_v44  ;;  %v814_v57 = vpop.f32.mrf.mxu0  ;;  %v974_v58 = vpop.f32.mrf.mxu1 }
 0x13d   :  { %v1453_v59 = vmul.f32 %v2631_v48, %v814_v57  ;;  %v1517_v60 = vmul.f32 %v2631_v48, %v974_v58  ;;  %v2293_v61 = vpack.c.bf16 %v1591_v55, %v1590_v51  ;;  %v1592_v1 = vadd.f32 %v2634_v52, %v1452_v49 }
 0x13e   :  { %v2325_v62 = vpack.c.bf16 %v1655_v56, %v1654_v53  ;;  %v816_v63 = vpop.f32.mrf.mxu0  ;;  %v976_v0 = vpop.f32.mrf.mxu1  ;;  %v1656_v2 = vadd.f32 %v2634_v52, %v1516_v50 }
 0x13f   :  { %v1593_v3 = vadd.f32 %v2637_v54, %v1453_v59  ;;  %v1657_v4 = vadd.f32 %v2637_v54, %v1517_v60  ;;  %2077 = vst [vmem:[#allocation3 + $0xc8] sm:$0xff] %v2293_v61  ;;  %v1454_v5 = vmul.f32 %v2626_v46, %v816_v63  ;;  %v1518_v6 = vmul.f32 %v2626_v46, %v976_v0 }
 0x140   :  { %2109 = vst [vmem:[#allocation3 + $0x1c8] sm:$0xff] %v2325_v62  ;;  %v818_v7 = vpop.f32.mrf.mxu0  ;;  %v978_v8 = vpop.f32.mrf.mxu1 }
 0x141   :  { %v2294_v9 = vpack.c.bf16 %v1593_v3, %v1592_v1  ;;  %v2326_v10 = vpack.c.bf16 %v1657_v4, %v1656_v2  ;;  %v1455_v11 = vmul.f32 %v2631_v48, %v818_v7  ;;  %v1519_v12 = vmul.f32 %v2631_v48, %v978_v8 }
 0x142   :  { %v822_v13 = vpop.f32.mrf.mxu0  ;;  %v982_v14 = vpop.f32.mrf.mxu1  ;;  %v1594_v17 = vadd.f32 %v2634_v52, %v1454_v5  ;;  %v1658_v18 = vadd.f32 %v2634_v52, %v1518_v6 }
 0x143   :  { %2078 = vst [vmem:[#allocation3 + $0xd0] sm:$0xff] %v2294_v9  ;;  %2110 = vst [vmem:[#allocation3 + $0x1d0] sm:$0xff] %v2326_v10  ;;  %v1456_v15 = vmul.f32 %v2626_v46, %v822_v13  ;;  %v1520_v16 = vmul.f32 %v2626_v46, %v982_v14  ;;  %v1595_v19 = vadd.f32 %v2637_v54, %v1455_v11 }
 0x144   :  { %v1659_v20 = vadd.f32 %v2637_v54, %v1519_v12  ;;  %v824_v21 = vpop.f32.mrf.mxu0  ;;  %v984_v22 = vpop.f32.mrf.mxu1 }
 0x145   :  { %v1457_v23 = vmul.f32 %v2631_v48, %v824_v21  ;;  %v1521_v24 = vmul.f32 %v2631_v48, %v984_v22  ;;  %v2295_v25 = vpack.c.bf16 %v1595_v19, %v1594_v17  ;;  %v1596_v29 = vadd.f32 %v2634_v52, %v1456_v15 }
 0x146   :  { %v2327_v26 = vpack.c.bf16 %v1659_v20, %v1658_v18  ;;  %v826_v27 = vpop.f32.mrf.mxu0  ;;  %v986_v28 = vpop.f32.mrf.mxu1  ;;  %v1660_v30 = vadd.f32 %v2634_v52, %v1520_v16 }
 0x147   :  { %v1597_v31 = vadd.f32 %v2637_v54, %v1457_v23  ;;  %v1661_v32 = vadd.f32 %v2637_v54, %v1521_v24  ;;  %2079 = vst [vmem:[#allocation3 + $0xd8] sm:$0xff] %v2295_v25  ;;  %v1458_v33 = vmul.f32 %v2626_v46, %v826_v27  ;;  %v1522_v34 = vmul.f32 %v2626_v46, %v986_v28 }
 0x148   :  { %2111 = vst [vmem:[#allocation3 + $0x1d8] sm:$0xff] %v2327_v26  ;;  %v828_v35 = vpop.f32.mrf.mxu0  ;;  %v988_v36 = vpop.f32.mrf.mxu1 }
 0x149   :  { %v2296_v37 = vpack.c.bf16 %v1597_v31, %v1596_v29  ;;  %v2328_v38 = vpack.c.bf16 %v1661_v32, %v1660_v30  ;;  %v1459_v39 = vmul.f32 %v2631_v48, %v828_v35  ;;  %v1523_v40 = vmul.f32 %v2631_v48, %v988_v36 }
 0x14a   :  { %v832_v41 = vpop.f32.mrf.mxu0  ;;  %v992_v42 = vpop.f32.mrf.mxu1  ;;  %v1598_v45 = vadd.f32 %v2634_v52, %v1458_v33  ;;  %v1662_v47 = vadd.f32 %v2634_v52, %v1522_v34 }
 0x14b   :  { %2080 = vst [vmem:[#allocation3 + $0xe0] sm:$0xff] %v2296_v37  ;;  %2112 = vst [vmem:[#allocation3 + $0x1e0] sm:$0xff] %v2328_v38  ;;  %v1460_v43 = vmul.f32 %v2626_v46, %v832_v41  ;;  %v1524_v44 = vmul.f32 %v2626_v46, %v992_v42  ;;  %v1599_v49 = vadd.f32 %v2637_v54, %v1459_v39 }
 0x14c   :  { %v1663_v50 = vadd.f32 %v2637_v54, %v1523_v40  ;;  %v834_v51 = vpop.f32.mrf.mxu0  ;;  %v994_v53 = vpop.f32.mrf.mxu1 }
 0x14d   :  { %v1461_v55 = vmul.f32 %v2631_v48, %v834_v51  ;;  %v1525_v56 = vmul.f32 %v2631_v48, %v994_v53  ;;  %v2297_v57 = vpack.c.bf16 %v1599_v49, %v1598_v45  ;;  %v1600_v61 = vadd.f32 %v2634_v52, %v1460_v43 }
 0x14e   :  { %v2329_v58 = vpack.c.bf16 %v1663_v50, %v1662_v47  ;;  %v836_v59 = vpop.f32.mrf.mxu0  ;;  %v996_v60 = vpop.f32.mrf.mxu1  ;;  %v1664_v62 = vadd.f32 %v2634_v52, %v1524_v44 }
 0x14f   :  { %v1601_v63 = vadd.f32 %v2637_v54, %v1461_v55  ;;  %v1665_v0 = vadd.f32 %v2637_v54, %v1525_v56  ;;  %2081 = vst [vmem:[#allocation3 + $0xe8] sm:$0xff] %v2297_v57  ;;  %v1462_v1 = vmul.f32 %v2626_v46, %v836_v59  ;;  %v1526_v2 = vmul.f32 %v2626_v46, %v996_v60 }
 0x150   :  { %2113 = vst [vmem:[#allocation3 + $0x1e8] sm:$0xff] %v2329_v58  ;;  %v838_v3 = vpop.f32.mrf.mxu0  ;;  %v998_v4 = vpop.f32.mrf.mxu1 }
 0x151   :  { %v2298_v5 = vpack.c.bf16 %v1601_v63, %v1600_v61  ;;  %v2330_v6 = vpack.c.bf16 %v1665_v0, %v1664_v62  ;;  %v1463_v7 = vmul.f32 %v2631_v48, %v838_v3  ;;  %v1527_v8 = vmul.f32 %v2631_v48, %v998_v4 }
 0x152   :  { %v1602_v9 = vadd.f32 %v2634_v52, %v1462_v1  ;;  %v1666_v10 = vadd.f32 %v2634_v52, %v1526_v2 }
 0x153   :  { %2082 = vst [vmem:[#allocation3 + $0xf0] sm:$0xff] %v2298_v5  ;;  %2114 = vst [vmem:[#allocation3 + $0x1f0] sm:$0xff] %v2330_v6  ;;  %v1603_v11 = vadd.f32 %v2637_v54, %v1463_v7  ;;  %v1667_v46 = vadd.f32 %v2637_v54, %v1527_v8 }
 0x155   :  { %v2299_v12 = vpack.c.bf16 %v1603_v11, %v1602_v9  ;;  %v2331_v13 = vpack.c.bf16 %v1667_v46, %v1666_v10 }
 0x157   :  { %2083 = vst [vmem:[#allocation3 + $0xf8] sm:$0xff] %v2299_v12  ;;  %2115 = vst [vmem:[#allocation3 + $0x1f8] sm:$0xff] %v2331_v13 }
 0x158   :  { %2399 = shalt.err (!%p2396_p4)
}
 0x159   :  { %s2412_s18 = smov 128   ;;  %s2413_s19 = smov 8  }
 0x15a   :  { %2127 = dma.vmem_to_hbm [thread:$0]  %s2122_s2, 8192, %s2900_s4, [#allocation4], %s2412_s18, %s2412_s18, %s2413_s19  }
 0x15b   :  { %2408 = dma.done.wait [#allocation4], 8192  }
 0x15c   :  { %2409 = vsyncadd [#allocation4], 4294959104 }
 0x15d   :  { %2131 = vsyncpa [#allocation4], 1 }

</bundles_post_ra>
